<compile_context>
chip_gen: v5e
topology: v5e:2x2
jax: 0.10.0
libtpu: 0.0.40
codegen_flags: <defaults>
</compile_context>

<pallas_src>
import jax
import jax.numpy as jnp
from jax.experimental import pallas as pl
from jax.experimental.pallas import tpu as pltpu

_R = 8  # batch rows folded into the lane axis (f32 sublane granularity)


def _mlp_kernel(x_ref, w1_ref, b1_ref, w2_ref, b2_ref, w3_ref, b3_ref, o_ref):
    # x_ref: (TB/R, R*D) -- R consecutive batch rows interleaved along lanes.
    x = x_ref[...]
    # fc1 + ReLU : (TB/R, R*D) @ (R*D, R*64) -> (TB/R, R*64)
    h1 = jnp.dot(x, w1_ref[...], preferred_element_type=jnp.float32) + b1_ref[...]
    h1 = jnp.maximum(h1, 0.0)
    # fc2 + ReLU : (TB/R, R*64) @ (R*64, R*32) -> (TB/R, R*32)
    h2 = jnp.dot(h1, w2_ref[...], preferred_element_type=jnp.float32) + b2_ref[...]
    h2 = jnp.maximum(h2, 0.0)
    # fc3 : (TB/R, R*32) @ (R*32, R) -> (TB/R, R)  (one logit per batch row)
    z = jnp.dot(h2, w3_ref[...], preferred_element_type=jnp.float32) + b3_ref[...]
    # sigmoid: exp and approx reciprocal both run on the EUP slot.
    o_ref[...] = pl.reciprocal(1.0 + jnp.exp(-z), approx=True)


def init_params(input_size, key):
    """Deterministic init mimicking nn.Linear's U(-1/sqrt(fan_in), 1/sqrt(fan_in))."""
    ks = jax.random.split(key, 6)

    def linear(kw, kb, fan_in, fan_out):
        bound = 1.0 / jnp.sqrt(jnp.float32(fan_in))
        w = jax.random.uniform(kw, (fan_out, fan_in), jnp.float32, -bound, bound)
        b = jax.random.uniform(kb, (fan_out,), jnp.float32, -bound, bound)
        return w, b

    w1, b1 = linear(ks[0], ks[1], input_size, 64)
    w2, b2 = linear(ks[2], ks[3], 64, 32)
    w3, b3 = linear(ks[4], ks[5], 32, 1)
    return {"w1": w1, "b1": b1, "w2": w2, "b2": b2, "w3": w3, "b3": b3}


def pack_params(params):
    """One-time expansion of the tiny weights into block-diagonal 'replica'
    matrices so the kernel can consume the lane-folded (B/R, R*D) input layout
    without any transpose.  Exact (the off-diagonal blocks are zero)."""
    w1, b1 = params["w1"], params["b1"]          # (H1, D), (H1,)
    w2, b2 = params["w2"], params["b2"]          # (H2, H1), (H2,)
    w3, b3 = params["w3"], params["b3"]          # (1, H2), (1,)
    H1, D = w1.shape
    H2 = w2.shape[0]
    R = _R
    eye = jnp.eye(R, dtype=jnp.float32)
    # W1e[(r*D+d), (o*R+s)] = delta(r,s) * w1[o,d]
    w1e = jnp.einsum("rs,od->rdos", eye, w1).reshape(R * D, H1 * R)
    # W2e[(i*R+r), (o*R+s)] = delta(r,s) * w2[o,i]
    w2e = jnp.einsum("rs,oi->iros", eye, w2).reshape(H1 * R, H2 * R)
    # W3e[(o*R+r), s]       = delta(r,s) * w3[0,o]
    w3e = jnp.einsum("rs,o->ors", eye, w3[0]).reshape(H2 * R, R)
    b1e = jnp.repeat(b1, R).reshape(1, H1 * R)
    b2e = jnp.repeat(b2, R).reshape(1, H2 * R)
    b3e = jnp.tile(b3.reshape(1, 1), (1, R))
    return {"R": R, "D": D,
            "w1e": w1e, "b1e": b1e,
            "w2e": w2e, "b2e": b2e,
            "w3e": w3e, "b3e": b3e}


def stock_direction_predictor(x, packed, *, tb_max=8192):
    """x: (B, input_size) float32. Returns (B, 1) sigmoid outputs."""
    B, D = x.shape
    R = packed["R"]
    assert D == packed["D"], "packed params built for a different input_size"
    w1e, b1e = packed["w1e"], packed["b1e"]
    w2e, b2e = packed["w2e"], packed["b2e"]
    w3e, b3e = packed["w3e"], packed["b3e"]
    KD, N1 = w1e.shape                         # (R*D, R*H1)
    N2 = w2e.shape[1]                          # R*H2
    H1, H2 = N1 // R, N2 // R

    # Lane-dense batch tile: always a multiple of 128 (review: validate tb_max).
    tb_max = max(128, (tb_max // 128) * 128)
    TB = min(tb_max, pl.cdiv(B, 128) * 128)
    # v7x has 2 TensorCores: keep >= 2 "parallel" grid steps when the batch is
    # big enough to split (v5e/v6e have a single TC; one tile is fine there).
    if pl.cdiv(B, TB) < 2 and B > 1024:
        TB = pl.cdiv(pl.cdiv(B, 2), 128) * 128
    num_tiles = pl.cdiv(B, TB)
    Bp = num_tiles * TB

    # Tail-only padding: a no-op whenever B is already a multiple of TB, so the
    # large-batch path streams x from HBM with no extra copy pass.
    if Bp != B:
        x = jnp.pad(x, ((0, Bp - B), (0, 0)))
    # Free, layout-preserving reshape (row-major dim merge): folds R=8
    # consecutive batch rows into the lane axis -> every block is lane-dense.
    x2 = x.reshape(Bp // R, R * D)

    flops = 2 * Bp * (D * H1 + H1 * H2 + H2)
    bytes_accessed = 4 * (Bp * D + Bp + w1e.size + w2e.size + w3e.size + N1 + N2 + R)
    cost = pl.CostEstimate(flops=flops, transcendentals=Bp,
                           bytes_accessed=bytes_accessed)

    MB = TB // R
    out2 = pl.pallas_call(
        _mlp_kernel,
        out_shape=jax.ShapeDtypeStruct((Bp // R, R), jnp.float32),
        grid=(num_tiles,),
        in_specs=[
            # x tile: one contiguous (TB*D*4)-byte DMA per step.  If profiling
            # ever shows exposed DMA at large TB, add pipeline_mode=pl.Buffered(3).
            pl.BlockSpec((MB, R * D), lambda i: (i, 0)),
            pl.BlockSpec((KD, N1), lambda i: (0, 0)),   # w1e (VMEM-resident)
            pl.BlockSpec((1, N1), lambda i: (0, 0)),    # b1e
            pl.BlockSpec((N1, N2), lambda i: (0, 0)),   # w2e
            pl.BlockSpec((1, N2), lambda i: (0, 0)),    # b2e
            pl.BlockSpec((N2, R), lambda i: (0, 0)),    # w3e
            pl.BlockSpec((1, R), lambda i: (0, 0)),     # b3e
        ],
        out_specs=pl.BlockSpec((MB, R), lambda i: (i, 0)),
        compiler_params=pltpu.CompilerParams(
            dimension_semantics=("parallel",),
            vmem_limit_bytes=32 * 1024 * 1024),
        cost_estimate=cost,
    )(x2, w1e, b1e, w2e, b2e, w3e, b3e)

    # Free reshape back to one prediction per row; drop padded tail rows.
    return out2.reshape(Bp, 1)[:B]


def _reference(x, params):
    h1 = jnp.maximum(x @ params["w1"].T + params["b1"], 0.0)
    h2 = jnp.maximum(h1 @ params["w2"].T + params["b2"], 0.0)
    z = h2 @ params["w3"].T + params["b3"]
    return jax.nn.sigmoid(z)


if __name__ == "__main__":
    key = jax.random.PRNGKey(0)
    k_in, k_in2, k_p = jax.random.split(key, 3)

    input_size = 16
    params = init_params(input_size, k_p)
    packed = pack_params(params)

    # Small shape consistent with the module (single padded tile).
    x_small = jax.random.normal(k_in, (8, input_size), jnp.float32)
    out_small = jax.block_until_ready(stock_direction_predictor(x_small, packed))
    ref_small = _reference(x_small, params)
    assert out_small.shape == (8, 1)
    # Tolerance covers the EUP approximate-reciprocal sigmoid (~1e-4 level error).
    assert jnp.allclose(out_small, ref_small, atol=2e-3, rtol=2e-3)

    # Exercise the multi-tile grid + ragged (padded) final tile path.
    x_big = jax.random.normal(k_in2, (300, input_size), jnp.float32)
    out_big = jax.block_until_ready(
        stock_direction_predictor(x_big, packed, tb_max=128))
    ref_big = _reference(x_big, params)
    assert out_big.shape == (300, 1)
    assert jnp.allclose(out_big, ref_big, atol=2e-3, rtol=2e-3)

    print("KERNEL_OK")
</pallas_src>

<mosaic_0001>
module attributes {stable_mosaic.version = 11 : i64} {
  func.func @_mlp_kernel(%arg0: i32, %arg1: memref<16x128xf32, #tpu.memory_space<vmem>>, %arg2: memref<128x512xf32, #tpu.memory_space<vmem>>, %arg3: memref<1x512xf32, #tpu.memory_space<vmem>>, %arg4: memref<512x256xf32, #tpu.memory_space<vmem>>, %arg5: memref<1x256xf32, #tpu.memory_space<vmem>>, %arg6: memref<256x8xf32, #tpu.memory_space<vmem>>, %arg7: memref<1x8xf32, #tpu.memory_space<vmem>>, %arg8: memref<16x8xf32, #tpu.memory_space<vmem>>) attributes {dimension_semantics = [#tpu.dimension_semantics<parallel>], iteration_bounds = array<i64: 1>, scalar_prefetch = 0 : i64, scratch_operands = 0 : i64, tpu.core_type = #tpu.core_type<tc>, window_params = [{transform_indices = @transform_0, window_bounds = array<i64: 16, 128>}, {pipeline_mode = #tpu.pipeline_mode<synchronous>, transform_indices = @transform_1, window_bounds = array<i64: 128, 512>}, {pipeline_mode = #tpu.pipeline_mode<synchronous>, transform_indices = @transform_2, window_bounds = array<i64: 1, 512>}, {pipeline_mode = #tpu.pipeline_mode<synchronous>, transform_indices = @transform_3, window_bounds = array<i64: 512, 256>}, {pipeline_mode = #tpu.pipeline_mode<synchronous>, transform_indices = @transform_4, window_bounds = array<i64: 1, 256>}, {pipeline_mode = #tpu.pipeline_mode<synchronous>, transform_indices = @transform_5, window_bounds = array<i64: 256, 8>}, {pipeline_mode = #tpu.pipeline_mode<synchronous>, transform_indices = @transform_6, window_bounds = array<i64: 1, 8>}, {transform_indices = @transform_7, window_bounds = array<i64: 16, 8>}]} {
    %c0 = arith.constant 0 : index
    %c0_0 = arith.constant 0 : index
    %0 = vector.load %arg1[%c0, %c0_0] : memref<16x128xf32, #tpu.memory_space<vmem>>, vector<16x128xf32>
    %c0_1 = arith.constant 0 : index
    %c0_2 = arith.constant 0 : index
    %1 = vector.load %arg2[%c0_1, %c0_2] : memref<128x512xf32, #tpu.memory_space<vmem>>, vector<128x512xf32>
    %cst = arith.constant dense<0.000000e+00> : vector<16x512xf32>
    %2 = tpu.matmul %0, %1, %cst {dimension_numbers = #tpu.dot_dimension_numbers<[1], [0], [0], [1], [0, 0, 1, 1], [], []>} : vector<16x128xf32>, vector<128x512xf32>, vector<16x512xf32> -> vector<16x512xf32>
    %c0_3 = arith.constant 0 : index
    %c0_4 = arith.constant 0 : index
    %3 = vector.load %arg3[%c0_3, %c0_4] : memref<1x512xf32, #tpu.memory_space<vmem>>, vector<1x512xf32>
    %4 = vector.broadcast %3 : vector<1x512xf32> to vector<16x512xf32>
    %5 = arith.addf %2, %4 : vector<16x512xf32>
    %cst_5 = arith.constant 0.000000e+00 : f32
    %6 = vector.broadcast %cst_5 : f32 to vector<16x512xf32>
    %7 = arith.maximumf %5, %6 : vector<16x512xf32>
    %c0_6 = arith.constant 0 : index
    %c0_7 = arith.constant 0 : index
    %8 = vector.load %arg4[%c0_6, %c0_7] : memref<512x256xf32, #tpu.memory_space<vmem>>, vector<512x256xf32>
    %cst_8 = arith.constant dense<0.000000e+00> : vector<16x256xf32>
    %9 = tpu.matmul %7, %8, %cst_8 {dimension_numbers = #tpu.dot_dimension_numbers<[1], [0], [0], [1], [0, 0, 1, 1], [], []>} : vector<16x512xf32>, vector<512x256xf32>, vector<16x256xf32> -> vector<16x256xf32>
    %c0_9 = arith.constant 0 : index
    %c0_10 = arith.constant 0 : index
    %10 = vector.load %arg5[%c0_9, %c0_10] : memref<1x256xf32, #tpu.memory_space<vmem>>, vector<1x256xf32>
    %11 = vector.broadcast %10 : vector<1x256xf32> to vector<16x256xf32>
    %12 = arith.addf %9, %11 : vector<16x256xf32>
    %cst_11 = arith.constant 0.000000e+00 : f32
    %13 = vector.broadcast %cst_11 : f32 to vector<16x256xf32>
    %14 = arith.maximumf %12, %13 : vector<16x256xf32>
    %c0_12 = arith.constant 0 : index
    %c0_13 = arith.constant 0 : index
    %15 = vector.load %arg6[%c0_12, %c0_13] : memref<256x8xf32, #tpu.memory_space<vmem>>, vector<256x8xf32>
    %cst_14 = arith.constant dense<0.000000e+00> : vector<16x8xf32>
    %16 = tpu.matmul %14, %15, %cst_14 {dimension_numbers = #tpu.dot_dimension_numbers<[1], [0], [0], [1], [0, 0, 1, 1], [], []>} : vector<16x256xf32>, vector<256x8xf32>, vector<16x8xf32> -> vector<16x8xf32>
    %c0_15 = arith.constant 0 : index
    %c0_16 = arith.constant 0 : index
    %17 = vector.load %arg7[%c0_15, %c0_16] : memref<1x8xf32, #tpu.memory_space<vmem>>, vector<1x8xf32>
    %18 = vector.broadcast %17 : vector<1x8xf32> to vector<16x8xf32>
    %19 = arith.addf %16, %18 : vector<16x8xf32>
    %cst_17 = arith.constant 0.000000e+00 : f32
    %20 = vector.broadcast %cst_17 : f32 to vector<16x8xf32>
    %21 = arith.subf %20, %19 : vector<16x8xf32>
    %22 = math.exp %21 : vector<16x8xf32>
    %cst_18 = arith.constant 1.000000e+00 : f32
    %23 = vector.broadcast %cst_18 : f32 to vector<16x8xf32>
    %24 = arith.addf %23, %22 : vector<16x8xf32>
    %25 = tpu.reciprocal %24 {approx = true} : vector<16x8xf32> -> vector<16x8xf32>
    %c0_19 = arith.constant 0 : index
    %c0_20 = arith.constant 0 : index
    %26 = vector.load %arg8[%c0_19, %c0_20] : memref<16x8xf32, #tpu.memory_space<vmem>>, vector<16x8xf32>
    tpu.vector_store %arg8[%c0_19, %c0_20], %25 {strides = array<i32>} : memref<16x8xf32, #tpu.memory_space<vmem>>, vector<16x8xf32>,
    return
  }
  func.func @transform_0(%arg0: i32) -> (i32, i32) {
    %c0_i32 = arith.constant 0 : i32
    %c0_i32_0 = arith.constant 0 : i32
    return %arg0, %c0_i32 : i32, i32
  }
  func.func @transform_1(%arg0: i32) -> (i32, i32) {
    %c0_i32 = arith.constant 0 : i32
    %c0_i32_0 = arith.constant 0 : i32
    %c0_i32_1 = arith.constant 0 : i32
    return %c0_i32, %c0_i32_0 : i32, i32
  }
  func.func @transform_2(%arg0: i32) -> (i32, i32) {
    %c0_i32 = arith.constant 0 : i32
    %c0_i32_0 = arith.constant 0 : i32
    %c0_i32_1 = arith.constant 0 : i32
    return %c0_i32, %c0_i32_0 : i32, i32
  }
  func.func @transform_3(%arg0: i32) -> (i32, i32) {
    %c0_i32 = arith.constant 0 : i32
    %c0_i32_0 = arith.constant 0 : i32
    %c0_i32_1 = arith.constant 0 : i32
    return %c0_i32, %c0_i32_0 : i32, i32
  }
  func.func @transform_4(%arg0: i32) -> (i32, i32) {
    %c0_i32 = arith.constant 0 : i32
    %c0_i32_0 = arith.constant 0 : i32
    %c0_i32_1 = arith.constant 0 : i32
    return %c0_i32, %c0_i32_0 : i32, i32
  }
  func.func @transform_5(%arg0: i32) -> (i32, i32) {
    %c0_i32 = arith.constant 0 : i32
    %c0_i32_0 = arith.constant 0 : i32
    %c0_i32_1 = arith.constant 0 : i32
    return %c0_i32, %c0_i32_0 : i32, i32
  }
  func.func @transform_6(%arg0: i32) -> (i32, i32) {
    %c0_i32 = arith.constant 0 : i32
    %c0_i32_0 = arith.constant 0 : i32
    %c0_i32_1 = arith.constant 0 : i32
    return %c0_i32, %c0_i32_0 : i32, i32
  }
  func.func @transform_7(%arg0: i32) -> (i32, i32) {
    %c0_i32 = arith.constant 0 : i32
    %c0_i32_0 = arith.constant 0 : i32
    return %arg0, %c0_i32 : i32, i32
  }
}

</mosaic_0001>

<bundles_post_ra>
// kernel: tpu_custom_call.1
= control target key start
LH: loop header
LB: loop body
LE: loop exit
PB: predicated region body
PF: predicated region fallthrough
CT: control target
= control target key end

     0   :  { %12 = vsyncpa [#allocation3], 0  ;;  %s925_s0 = inlined_call_operand.vmem [shape: f32[16,128], index: 0, kind: input, shape index: {}]   ;;  %s926_s1 = inlined_call_operand.hbm [shape: f32[128,512], index: 1, kind: input, shape index: {}]   ;;  %s927_s2 = inlined_call_operand.vmem [shape: f32[1,512], index: 2, kind: input, shape index: {}]   ;;  %s928_s3 = inlined_call_operand.hbm [shape: f32[512,256], index: 3, kind: input, shape index: {}]   ;;  %s929_s4 = inlined_call_operand.vmem [shape: f32[1,256], index: 4, kind: input, shape index: {}]   ;;  %s930_s5 = inlined_call_operand.vmem [shape: f32[256,8], index: 5, kind: input, shape index: {}]   ;;  %s931_s6 = inlined_call_operand.vmem [shape: f32[1,8], index: 6, kind: input, shape index: {}]   ;;  %s932_s7 = inlined_call_operand.vmem [shape: f32[16,8], index: 7, kind: output, shape index: {}]  }
   0x1   :  { %s20_s26 = sshll.u32 %s926_s1, 4  ;;  %s21_s26 = int_to_ptr.hbm [resolvable:$true] %s20_s26 }
   0x2   :  { %13 = vsyncpa [#allocation5], 0  ;;  %s756_s27 = smov [#allocation2]   ;;  %s35_s8 = sshll.u32 %s928_s3, 4  ;;  %s36_s8 = int_to_ptr.hbm [resolvable:$true] %s35_s8 }
   0x3   :  { %s22_s28 = sshll.u32 %s756_s27, 4  ;;  %s757_s9 = smov 512   ;;  %s23_s28 = int_to_ptr.vmem [resolvable:$true] %s22_s28 }
   0x4   :  { %s758_s10 = smov 32   ;;  %s759_s11 = smov [#allocation4]  }
   0x5   :  { %28 = dma.hbm_to_vmem [thread:$0]  %s21_s26, 8192, %s23_s28, [#allocation3], %s757_s9, %s757_s9, %s758_s10  }
   0x6   :  { %s37_s12 = sshll.u32 %s759_s11, 4  ;;  %s760_s13 = smov 256   ;;  %s38_s12 = int_to_ptr.vmem [resolvable:$true] %s37_s12 }
   0x7   :  { %s761_s14 = smov 16  }
   0x8   :  { %43 = dma.hbm_to_vmem [thread:$0]  %s36_s8, 16384, %s38_s12, [#allocation5], %s760_s13, %s760_s13, %s761_s14  }
   0x9   :  { %752 = dma.done.wait [#allocation3], 8192  }
   0xa   :  { %753 = vsyncadd [#allocation3], 4294959104 }
   0xb   :  { %754 = dma.done.wait [#allocation5], 16384  }
   0xc   :  { %755 = vsyncadd [#allocation5], 4294950912  ;;  %v120_v0 = vld [vmem:[#allocation2 + $0x1e0] sm:$0xff]  ;;  %v121_v1 = vld [vmem:[#allocation2 + $0x1e8] sm:$0xff]  ;;  %vm648_vm0 = vcmask 64512  }
   0xd   :  { %v122_v2 = vld [vmem:[#allocation2 + $0x1f0] sm:$0xff]  ;;  %134 = vmatpush.msra.mxu0 %v120_v0  ;;  %157 = vmatpush.msra.mxu1 %v121_v1  ;;  %v123_v3 = vld [vmem:[#allocation2 + $0x1f8] sm:$0xff]  ;;  %v116_v4 = vld [vmem:[#allocation2 + $0x1c0] sm:$0xff] }
   0xe   :  { %v117_v5 = vld [vmem:[#allocation2 + $0x1c8] sm:$0xff]  ;;  %180 = vmatpush.msra.mxu2 %v122_v2  ;;  %203 = vmatpush.msra.mxu3 %v123_v3  ;;  %v118_v6 = vld [vmem:[#allocation2 + $0x1d0] sm:$0xff]  ;;  %v119_v7 = vld [vmem:[#allocation2 + $0x1d8] sm:$0xff] }
   0xf   :  { %v112_v8 = vld [vmem:[#allocation2 + $0x1a0] sm:$0xff]  ;;  %135 = vmatpush.msra.mxu0 %v116_v4  ;;  %158 = vmatpush.msra.mxu1 %v117_v5  ;;  %v113_v9 = vld [vmem:[#allocation2 + $0x1a8] sm:$0xff]  ;;  %v114_v10 = vld [vmem:[#allocation2 + $0x1b0] sm:$0xff] }
  0x10   :  { %v115_v11 = vld [vmem:[#allocation2 + $0x1b8] sm:$0xff]  ;;  %181 = vmatpush.msra.mxu2 %v118_v6  ;;  %204 = vmatpush.msra.mxu3 %v119_v7  ;;  %v108_v12 = vld [vmem:[#allocation2 + $0x180] sm:$0xff]  ;;  %v109_v13 = vld [vmem:[#allocation2 + $0x188] sm:$0xff] }
  0x11   :  { %136 = vmatpush.msra.mxu0 %v112_v8  ;;  %159 = vmatpush.msra.mxu1 %v113_v9  ;;  %v110_v14 = vld [vmem:[#allocation2 + $0x190] sm:$0xff]  ;;  %v111_v15 = vld [vmem:[#allocation2 + $0x198] sm:$0xff]  ;;  %v104_v16 = vld [vmem:[#allocation2 + $0x160] sm:$0xff] }
  0x12   :  { %182 = vmatpush.msra.mxu2 %v114_v10  ;;  %205 = vmatpush.msra.mxu3 %v115_v11  ;;  %v105_v17 = vld [vmem:[#allocation2 + $0x168] sm:$0xff]  ;;  %v106_v18 = vld [vmem:[#allocation2 + $0x170] sm:$0xff]  ;;  %v107_v19 = vld [vmem:[#allocation2 + $0x178] sm:$0xff] }
  0x13   :  { %137 = vmatpush.msra.mxu0 %v108_v12  ;;  %160 = vmatpush.msra.mxu1 %v109_v13  ;;  %v100_v20 = vld [vmem:[#allocation2 + $0x140] sm:$0xff]  ;;  %v101_v21 = vld [vmem:[#allocation2 + $0x148] sm:$0xff]  ;;  %v102_v22 = vld [vmem:[#allocation2 + $0x150] sm:$0xff] }
  0x14   :  { %183 = vmatpush.msra.mxu2 %v110_v14  ;;  %206 = vmatpush.msra.mxu3 %v111_v15  ;;  %v103_v23 = vld [vmem:[#allocation2 + $0x158] sm:$0xff]  ;;  %v96_v24 = vld [vmem:[#allocation2 + $0x120] sm:$0xff]  ;;  %v97_v25 = vld [vmem:[#allocation2 + $0x128] sm:$0xff] }
  0x15   :  { %138 = vmatpush.msra.mxu0 %v104_v16  ;;  %161 = vmatpush.msra.mxu1 %v105_v17  ;;  %v98_v26 = vld [vmem:[#allocation2 + $0x130] sm:$0xff]  ;;  %v99_v27 = vld [vmem:[#allocation2 + $0x138] sm:$0xff]  ;;  %v92_v28 = vld [vmem:[#allocation2 + $0x100] sm:$0xff] }
  0x16   :  { %184 = vmatpush.msra.mxu2 %v106_v18  ;;  %207 = vmatpush.msra.mxu3 %v107_v19  ;;  %v93_v29 = vld [vmem:[#allocation2 + $0x108] sm:$0xff]  ;;  %v94_v30 = vld [vmem:[#allocation2 + $0x110] sm:$0xff]  ;;  %v95_v31 = vld [vmem:[#allocation2 + $0x118] sm:$0xff] }
  0x17   :  { %139 = vmatpush.msra.mxu0 %v100_v20  ;;  %162 = vmatpush.msra.mxu1 %v101_v21  ;;  %v88_v32 = vld [vmem:[#allocation2 + $0xe0] sm:$0xff]  ;;  %v89_v33 = vld [vmem:[#allocation2 + $0xe8] sm:$0xff]  ;;  %v90_v34 = vld [vmem:[#allocation2 + $0xf0] sm:$0xff] }
  0x18   :  { %185 = vmatpush.msra.mxu2 %v102_v22  ;;  %208 = vmatpush.msra.mxu3 %v103_v23  ;;  %v91_v35 = vld [vmem:[#allocation2 + $0xf8] sm:$0xff]  ;;  %v84_v36 = vld [vmem:[#allocation2 + $0xc0] sm:$0xff]  ;;  %v85_v37 = vld [vmem:[#allocation2 + $0xc8] sm:$0xff] }
  0x19   :  { %140 = vmatpush.msra.mxu0 %v96_v24  ;;  %163 = vmatpush.msra.mxu1 %v97_v25  ;;  %v86_v38 = vld [vmem:[#allocation2 + $0xd0] sm:$0xff]  ;;  %v87_v39 = vld [vmem:[#allocation2 + $0xd8] sm:$0xff]  ;;  %v80_v40 = vld [vmem:[#allocation2 + $0xa0] sm:$0xff] }
  0x1a   :  { %186 = vmatpush.msra.mxu2 %v98_v26  ;;  %209 = vmatpush.msra.mxu3 %v99_v27  ;;  %v81_v41 = vld [vmem:[#allocation2 + $0xa8] sm:$0xff]  ;;  %v82_v42 = vld [vmem:[#allocation2 + $0xb0] sm:$0xff]  ;;  %v83_v43 = vld [vmem:[#allocation2 + $0xb8] sm:$0xff] }
  0x1b   :  { %141 = vmatpush.msra.mxu0 %v92_v28  ;;  %164 = vmatpush.msra.mxu1 %v93_v29  ;;  %v76_v44 = vld [vmem:[#allocation2 + $0x80] sm:$0xff]  ;;  %v77_v45 = vld [vmem:[#allocation2 + $0x88] sm:$0xff]  ;;  %v78_v46 = vld [vmem:[#allocation2 + $0x90] sm:$0xff] }
  0x1c   :  { %187 = vmatpush.msra.mxu2 %v94_v30  ;;  %210 = vmatpush.msra.mxu3 %v95_v31  ;;  %v79_v47 = vld [vmem:[#allocation2 + $0x98] sm:$0xff]  ;;  %v72_v48 = vld [vmem:[#allocation2 + $0x60] sm:$0xff]  ;;  %v73_v49 = vld [vmem:[#allocation2 + $0x68] sm:$0xff] }
  0x1d   :  { %142 = vmatpush.msra.mxu0 %v88_v32  ;;  %165 = vmatpush.msra.mxu1 %v89_v33  ;;  %v74_v50 = vld [vmem:[#allocation2 + $0x70] sm:$0xff]  ;;  %v75_v51 = vld [vmem:[#allocation2 + $0x78] sm:$0xff]  ;;  %v68_v52 = vld [vmem:[#allocation2 + $0x40] sm:$0xff] }
  0x1e   :  { %188 = vmatpush.msra.mxu2 %v90_v34  ;;  %211 = vmatpush.msra.mxu3 %v91_v35  ;;  %v69_v53 = vld [vmem:[#allocation2 + $0x48] sm:$0xff]  ;;  %v70_v54 = vld [vmem:[#allocation2 + $0x50] sm:$0xff]  ;;  %v71_v55 = vld [vmem:[#allocation2 + $0x58] sm:$0xff] }
  0x1f   :  { %143 = vmatpush.msra.mxu0 %v84_v36  ;;  %166 = vmatpush.msra.mxu1 %v85_v37  ;;  %v64_v56 = vld [vmem:[#allocation2 + $0x20] sm:$0xff]  ;;  %v65_v57 = vld [vmem:[#allocation2 + $0x28] sm:$0xff]  ;;  %v66_v58 = vld [vmem:[#allocation2 + $0x30] sm:$0xff] }
  0x20   :  { %189 = vmatpush.msra.mxu2 %v86_v38  ;;  %212 = vmatpush.msra.mxu3 %v87_v39  ;;  %v67_v59 = vld [vmem:[#allocation2 + $0x38] sm:$0xff]  ;;  %v60_v60 = vld [vmem:[#allocation2] sm:$0xff]  ;;  %v61_v61 = vld [vmem:[#allocation2 + $0x8] sm:$0xff] }
  0x21   :  { %144 = vmatpush.msra.mxu0 %v80_v40  ;;  %167 = vmatpush.msra.mxu1 %v81_v41  ;;  %v62_v62 = vld [vmem:[#allocation2 + $0x10] sm:$0xff]  ;;  %v63_v63 = vld [vmem:[#allocation2 + $0x18] sm:$0xff]  ;;  %v58_v0 = vld [vmem:[%s925_s0] sm:$0xff] }
  0x22   :  { %190 = vmatpush.msra.mxu2 %v82_v42  ;;  %213 = vmatpush.msra.mxu3 %v83_v43  ;;  %v264_v1 = vld [vmem:[#allocation4 + $0xf0] sm:$0xff]  ;;  %v262_v5 = vld [vmem:[#allocation4 + $0xe0] sm:$0xff]  ;;  %v59_v13 = vld [vmem:[%s925_s0 + $0x8] sm:$0xff] }
  0x23   :  { %145 = vmatpush.msra.mxu0 %v76_v44  ;;  %168 = vmatpush.msra.mxu1 %v77_v45  ;;  %v296_v2 = vld [vmem:[#allocation4 + $0x1f0] sm:$0xff]  ;;  %v294_v6 = vld [vmem:[#allocation4 + $0x1e0] sm:$0xff] }
  0x24   :  { %191 = vmatpush.msra.mxu2 %v78_v46  ;;  %214 = vmatpush.msra.mxu3 %v79_v47  ;;  %v328_v3 = vld [vmem:[#allocation4 + $0x2f0] sm:$0xff]  ;;  %v326_v7 = vld [vmem:[#allocation4 + $0x2e0] sm:$0xff] }
  0x25   :  { %146 = vmatpush.msra.mxu0 %v72_v48  ;;  %169 = vmatpush.msra.mxu1 %v73_v49  ;;  %v360_v4 = vld [vmem:[#allocation4 + $0x3f0] sm:$0xff]  ;;  %v358_v8 = vld [vmem:[#allocation4 + $0x3e0] sm:$0xff] }
  0x26   :  { %192 = vmatpush.msra.mxu2 %v74_v50  ;;  %215 = vmatpush.msra.mxu3 %v75_v51  ;;  %v260_v9 = vld [vmem:[#allocation4 + $0xd0] sm:$0xff]  ;;  %v258_v14 = vld [vmem:[#allocation4 + $0xc0] sm:$0xff] }
  0x27   :  { %147 = vmatpush.msra.mxu0 %v68_v52  ;;  %170 = vmatpush.msra.mxu1 %v69_v53  ;;  %v292_v10 = vld [vmem:[#allocation4 + $0x1d0] sm:$0xff]  ;;  %v290_v15 = vld [vmem:[#allocation4 + $0x1c0] sm:$0xff] }
  0x28   :  { %193 = vmatpush.msra.mxu2 %v70_v54  ;;  %216 = vmatpush.msra.mxu3 %v71_v55  ;;  %v324_v11 = vld [vmem:[#allocation4 + $0x2d0] sm:$0xff]  ;;  %v322_v16 = vld [vmem:[#allocation4 + $0x2c0] sm:$0xff] }
  0x29   :  { %148 = vmatpush.msra.mxu0 %v64_v56  ;;  %171 = vmatpush.msra.mxu1 %v65_v57  ;;  %v356_v12 = vld [vmem:[#allocation4 + $0x3d0] sm:$0xff]  ;;  %v354_v17 = vld [vmem:[#allocation4 + $0x3c0] sm:$0xff] }
  0x2a   :  { %194 = vmatpush.msra.mxu2 %v66_v58  ;;  %217 = vmatpush.msra.mxu3 %v67_v59  ;;  %v256_v18 = vld [vmem:[#allocation4 + $0xb0] sm:$0xff]  ;;  %v254_v22 = vld [vmem:[#allocation4 + $0xa0] sm:$0xff] }
  0x2b   :  { %149 = vmatpush.msra.mxu0 %v60_v60  ;;  %172 = vmatpush.msra.mxu1 %v61_v61  ;;  %v288_v19 = vld [vmem:[#allocation4 + $0x1b0] sm:$0xff]  ;;  %v286_v23 = vld [vmem:[#allocation4 + $0x1a0] sm:$0xff] }
  0x2c   :  { %195 = vmatpush.msra.mxu2 %v62_v62  ;;  %218 = vmatpush.msra.mxu3 %v63_v63  ;;  %v320_v20 = vld [vmem:[#allocation4 + $0x2b0] sm:$0xff]  ;;  %v318_v24 = vld [vmem:[#allocation4 + $0x2a0] sm:$0xff] }
  0x2d   :  { %150 = vmatmul.f32.vlgmr.msra.gmra.mxu0 %v58_v0  ;;  %173 = vmatmul.f32.vlgmr.msra.gmra.mxu1 %v58_v0  ;;  %v352_v21 = vld [vmem:[#allocation4 + $0x3b0] sm:$0xff]  ;;  %v350_v25 = vld [vmem:[#allocation4 + $0x3a0] sm:$0xff] }
  0x2e   :  { %196 = vmatmul.f32.vlgmr.msra.gmra.mxu2 %v58_v0  ;;  %219 = vmatmul.f32.vlgmr.msra.gmra.mxu3 %v58_v0  ;;  %v252_v26 = vld [vmem:[#allocation4 + $0x90] sm:$0xff]  ;;  %v250_v30 = vld [vmem:[#allocation4 + $0x80] sm:$0xff]  ;;  %v265_v0 = vld [vmem:[#allocation4 + $0xf8] sm:$0xff] }
  0x2f   :  { %368 = vmatpush.msrb.mxu0 %v264_v1  ;;  %391 = vmatpush.msrb.mxu1 %v296_v2  ;;  %v284_v27 = vld [vmem:[#allocation4 + $0x190] sm:$0xff]  ;;  %v282_v31 = vld [vmem:[#allocation4 + $0x180] sm:$0xff]  ;;  %v297_v1 = vld [vmem:[#allocation4 + $0x1f8] sm:$0xff] }
  0x30   :  { %414 = vmatpush.msrb.mxu2 %v328_v3  ;;  %437 = vmatpush.msrb.mxu3 %v360_v4  ;;  %v316_v28 = vld [vmem:[#allocation4 + $0x290] sm:$0xff]  ;;  %v314_v32 = vld [vmem:[#allocation4 + $0x280] sm:$0xff]  ;;  %v263_v4 = vld [vmem:[#allocation4 + $0xe8] sm:$0xff] }
  0x31   :  { %369 = vmatpush.msrb.mxu0 %v262_v5  ;;  %392 = vmatpush.msrb.mxu1 %v294_v6  ;;  %v348_v29 = vld [vmem:[#allocation4 + $0x390] sm:$0xff]  ;;  %v346_v33 = vld [vmem:[#allocation4 + $0x380] sm:$0xff]  ;;  %v295_v5 = vld [vmem:[#allocation4 + $0x1e8] sm:$0xff] }
  0x32   :  { %415 = vmatpush.msrb.mxu2 %v326_v7  ;;  %438 = vmatpush.msrb.mxu3 %v358_v8  ;;  %v248_v34 = vld [vmem:[#allocation4 + $0x70] sm:$0xff]  ;;  %v246_v38 = vld [vmem:[#allocation4 + $0x60] sm:$0xff]  ;;  %v329_v6 = vld [vmem:[#allocation4 + $0x2f8] sm:$0xff] }
  0x33   :  { %370 = vmatpush.msrb.mxu0 %v260_v9  ;;  %393 = vmatpush.msrb.mxu1 %v292_v10  ;;  %v280_v35 = vld [vmem:[#allocation4 + $0x170] sm:$0xff]  ;;  %v278_v39 = vld [vmem:[#allocation4 + $0x160] sm:$0xff]  ;;  %v361_v7 = vld [vmem:[#allocation4 + $0x3f8] sm:$0xff] }
  0x34   :  { %416 = vmatpush.msrb.mxu2 %v324_v11  ;;  %439 = vmatpush.msrb.mxu3 %v356_v12  ;;  %v312_v36 = vld [vmem:[#allocation4 + $0x270] sm:$0xff]  ;;  %v310_v40 = vld [vmem:[#allocation4 + $0x260] sm:$0xff]  ;;  %v261_v8 = vld [vmem:[#allocation4 + $0xd8] sm:$0xff] }
  0x35   :  { %153 = vmatmul.f32.gmra.mxu0 %v59_v13  ;;  %176 = vmatmul.f32.gmra.mxu1 %v59_v13  ;;  %v344_v37 = vld [vmem:[#allocation4 + $0x370] sm:$0xff]  ;;  %v342_v41 = vld [vmem:[#allocation4 + $0x360] sm:$0xff]  ;;  %v293_v9 = vld [vmem:[#allocation4 + $0x1d8] sm:$0xff] }
  0x36   :  { %199 = vmatmul.f32.gmra.mxu2 %v59_v13  ;;  %222 = vmatmul.f32.gmra.mxu3 %v59_v13  ;;  %v244_v42 = vld [vmem:[#allocation4 + $0x50] sm:$0xff]  ;;  %v242_v46 = vld [vmem:[#allocation4 + $0x40] sm:$0xff]  ;;  %v327_v10 = vld [vmem:[#allocation4 + $0x2e8] sm:$0xff] }
  0x37   :  { %371 = vmatpush.msrb.mxu0 %v258_v14  ;;  %394 = vmatpush.msrb.mxu1 %v290_v15  ;;  %v276_v43 = vld [vmem:[#allocation4 + $0x150] sm:$0xff]  ;;  %v274_v47 = vld [vmem:[#allocation4 + $0x140] sm:$0xff]  ;;  %v359_v11 = vld [vmem:[#allocation4 + $0x3e8] sm:$0xff] }
  0x38   :  { %417 = vmatpush.msrb.mxu2 %v322_v16  ;;  %440 = vmatpush.msrb.mxu3 %v354_v17  ;;  %v308_v44 = vld [vmem:[#allocation4 + $0x250] sm:$0xff]  ;;  %v306_v48 = vld [vmem:[#allocation4 + $0x240] sm:$0xff]  ;;  %v259_v12 = vld [vmem:[#allocation4 + $0xc8] sm:$0xff] }
  0x39   :  { %372 = vmatpush.msrb.mxu0 %v256_v18  ;;  %395 = vmatpush.msrb.mxu1 %v288_v19  ;;  %v340_v45 = vld [vmem:[#allocation4 + $0x350] sm:$0xff]  ;;  %v338_v49 = vld [vmem:[#allocation4 + $0x340] sm:$0xff]  ;;  %v291_v13 = vld [vmem:[#allocation4 + $0x1c8] sm:$0xff] }
  0x3a   :  { %418 = vmatpush.msrb.mxu2 %v320_v20  ;;  %441 = vmatpush.msrb.mxu3 %v352_v21  ;;  %v240_v50 = vld [vmem:[#allocation4 + $0x30] sm:$0xff]  ;;  %v238_v54 = vld [vmem:[#allocation4 + $0x20] sm:$0xff]  ;;  %v257_v14 = vld [vmem:[#allocation4 + $0xb8] sm:$0xff] }
  0x3b   :  { %373 = vmatpush.msrb.mxu0 %v254_v22  ;;  %396 = vmatpush.msrb.mxu1 %v286_v23  ;;  %v272_v51 = vld [vmem:[#allocation4 + $0x130] sm:$0xff]  ;;  %v270_v55 = vld [vmem:[#allocation4 + $0x120] sm:$0xff]  ;;  %v289_v15 = vld [vmem:[#allocation4 + $0x1b8] sm:$0xff] }
  0x3c   :  { %419 = vmatpush.msrb.mxu2 %v318_v24  ;;  %442 = vmatpush.msrb.mxu3 %v350_v25  ;;  %v304_v52 = vld [vmem:[#allocation4 + $0x230] sm:$0xff]  ;;  %v302_v56 = vld [vmem:[#allocation4 + $0x220] sm:$0xff]  ;;  %v255_v16 = vld [vmem:[#allocation4 + $0xa8] sm:$0xff] }
  0x3d   :  { %374 = vmatpush.msrb.mxu0 %v252_v26  ;;  %397 = vmatpush.msrb.mxu1 %v284_v27  ;;  %v336_v53 = vld [vmem:[#allocation4 + $0x330] sm:$0xff]  ;;  %v334_v57 = vld [vmem:[#allocation4 + $0x320] sm:$0xff]  ;;  %v287_v17 = vld [vmem:[#allocation4 + $0x1a8] sm:$0xff] }
  0x3e   :  { %420 = vmatpush.msrb.mxu2 %v316_v28  ;;  %443 = vmatpush.msrb.mxu3 %v348_v29  ;;  %v236_v58 = vld [vmem:[#allocation4 + $0x10] sm:$0xff]  ;;  %v234_v62 = vld [vmem:[#allocation4] sm:$0xff]  ;;  %v325_v18 = vld [vmem:[#allocation4 + $0x2d8] sm:$0xff] }
  0x3f   :  { %375 = vmatpush.msrb.mxu0 %v250_v30  ;;  %398 = vmatpush.msrb.mxu1 %v282_v31  ;;  %v268_v59 = vld [vmem:[#allocation4 + $0x110] sm:$0xff]  ;;  %v266_v63 = vld [vmem:[#allocation4 + $0x100] sm:$0xff]  ;;  %v357_v19 = vld [vmem:[#allocation4 + $0x3d8] sm:$0xff] }
  0x40   :  { %421 = vmatpush.msrb.mxu2 %v314_v32  ;;  %444 = vmatpush.msrb.mxu3 %v346_v33  ;;  %v300_v60 = vld [vmem:[#allocation4 + $0x210] sm:$0xff]  ;;  %v298_v2 = vld [vmem:[#allocation4 + $0x200] sm:$0xff]  ;;  %v253_v20 = vld [vmem:[#allocation4 + $0x98] sm:$0xff] }
  0x41   :  { %376 = vmatpush.msrb.mxu0 %v248_v34  ;;  %399 = vmatpush.msrb.mxu1 %v280_v35  ;;  %v332_v61 = vld [vmem:[#allocation4 + $0x310] sm:$0xff]  ;;  %v330_v3 = vld [vmem:[#allocation4 + $0x300] sm:$0xff]  ;;  %v285_v21 = vld [vmem:[#allocation4 + $0x198] sm:$0xff] }
  0x42   :  { %422 = vmatpush.msrb.mxu2 %v312_v36  ;;  %445 = vmatpush.msrb.mxu3 %v344_v37  ;;  %v323_v22 = vld [vmem:[#allocation4 + $0x2c8] sm:$0xff]  ;;  %v321_v26 = vld [vmem:[#allocation4 + $0x2b8] sm:$0xff] }
  0x43   :  { %377 = vmatpush.msrb.mxu0 %v246_v38  ;;  %400 = vmatpush.msrb.mxu1 %v278_v39  ;;  %v355_v23 = vld [vmem:[#allocation4 + $0x3c8] sm:$0xff]  ;;  %v353_v27 = vld [vmem:[#allocation4 + $0x3b8] sm:$0xff] }
  0x44   :  { %423 = vmatpush.msrb.mxu2 %v310_v40  ;;  %446 = vmatpush.msrb.mxu3 %v342_v41  ;;  %v251_v24 = vld [vmem:[#allocation4 + $0x88] sm:$0xff]  ;;  %v249_v28 = vld [vmem:[#allocation4 + $0x78] sm:$0xff] }
  0x45   :  { %378 = vmatpush.msrb.mxu0 %v244_v42  ;;  %401 = vmatpush.msrb.mxu1 %v276_v43  ;;  %v283_v25 = vld [vmem:[#allocation4 + $0x188] sm:$0xff]  ;;  %v281_v29 = vld [vmem:[#allocation4 + $0x178] sm:$0xff] }
  0x46   :  { %424 = vmatpush.msrb.mxu2 %v308_v44  ;;  %447 = vmatpush.msrb.mxu3 %v340_v45  ;;  %v319_v30 = vld [vmem:[#allocation4 + $0x2a8] sm:$0xff]  ;;  %v317_v34 = vld [vmem:[#allocation4 + $0x298] sm:$0xff] }
  0x47   :  { %379 = vmatpush.msrb.mxu0 %v242_v46  ;;  %402 = vmatpush.msrb.mxu1 %v274_v47  ;;  %v351_v31 = vld [vmem:[#allocation4 + $0x3a8] sm:$0xff]  ;;  %v349_v35 = vld [vmem:[#allocation4 + $0x398] sm:$0xff] }
  0x48   :  { %425 = vmatpush.msrb.mxu2 %v306_v48  ;;  %448 = vmatpush.msrb.mxu3 %v338_v49  ;;  %v247_v32 = vld [vmem:[#allocation4 + $0x68] sm:$0xff]  ;;  %v245_v36 = vld [vmem:[#allocation4 + $0x58] sm:$0xff] }
  0x49   :  { %380 = vmatpush.msrb.mxu0 %v240_v50  ;;  %403 = vmatpush.msrb.mxu1 %v272_v51  ;;  %v279_v33 = vld [vmem:[#allocation4 + $0x168] sm:$0xff]  ;;  %v277_v37 = vld [vmem:[#allocation4 + $0x158] sm:$0xff] }
  0x4a   :  { %426 = vmatpush.msrb.mxu2 %v304_v52  ;;  %449 = vmatpush.msrb.mxu3 %v336_v53  ;;  %v315_v38 = vld [vmem:[#allocation4 + $0x288] sm:$0xff]  ;;  %v313_v42 = vld [vmem:[#allocation4 + $0x278] sm:$0xff] }
  0x4b   :  { %381 = vmatpush.msrb.mxu0 %v238_v54  ;;  %404 = vmatpush.msrb.mxu1 %v270_v55  ;;  %v347_v39 = vld [vmem:[#allocation4 + $0x388] sm:$0xff]  ;;  %v345_v43 = vld [vmem:[#allocation4 + $0x378] sm:$0xff] }
  0x4c   :  { %427 = vmatpush.msrb.mxu2 %v302_v56  ;;  %450 = vmatpush.msrb.mxu3 %v334_v57  ;;  %v243_v40 = vld [vmem:[#allocation4 + $0x48] sm:$0xff]  ;;  %v241_v44 = vld [vmem:[#allocation4 + $0x38] sm:$0xff] }
  0x4d   :  { %382 = vmatpush.msrb.mxu0 %v236_v58  ;;  %405 = vmatpush.msrb.mxu1 %v268_v59  ;;  %v275_v41 = vld [vmem:[#allocation4 + $0x148] sm:$0xff]  ;;  %v273_v45 = vld [vmem:[#allocation4 + $0x138] sm:$0xff] }
  0x4e   :  { %428 = vmatpush.msrb.mxu2 %v300_v60  ;;  %451 = vmatpush.msrb.mxu3 %v332_v61  ;;  %v311_v46 = vld [vmem:[#allocation4 + $0x268] sm:$0xff]  ;;  %v309_v50 = vld [vmem:[#allocation4 + $0x258] sm:$0xff] }
  0x4f   :  { %383 = vmatpush.msrb.mxu0 %v234_v62  ;;  %406 = vmatpush.msrb.mxu1 %v266_v63  ;;  %v343_v47 = vld [vmem:[#allocation4 + $0x368] sm:$0xff]  ;;  %v341_v51 = vld [vmem:[#allocation4 + $0x358] sm:$0xff] }
  0x50   :  { %429 = vmatpush.msrb.mxu2 %v298_v2  ;;  %452 = vmatpush.msrb.mxu3 %v330_v3  ;;  %v239_v48 = vld [vmem:[#allocation4 + $0x28] sm:$0xff]  ;;  %v237_v52 = vld [vmem:[#allocation4 + $0x18] sm:$0xff]  ;;  %v124_v2 = vld [vmem:[%s927_s2] sm:$0xf] }
  0x51   :  { %460 = vmatpush.msra.mxu0 %v265_v0  ;;  %483 = vmatpush.msra.mxu1 %v297_v1  ;;  %v271_v49 = vld [vmem:[#allocation4 + $0x128] sm:$0xff]  ;;  %v269_v53 = vld [vmem:[#allocation4 + $0x118] sm:$0xff]  ;;  %v126_v3 = vperm.slane %v124_v2, 0 }
  0x52   :  { %506 = vmatpush.msra.mxu2 %v329_v6  ;;  %529 = vmatpush.msra.mxu3 %v361_v7  ;;  %v307_v54 = vld [vmem:[#allocation4 + $0x248] sm:$0xff]  ;;  %v305_v58 = vld [vmem:[#allocation4 + $0x238] sm:$0xff] }
  0x53   :  { %461 = vmatpush.msra.mxu0 %v263_v4  ;;  %484 = vmatpush.msra.mxu1 %v295_v5  ;;  %v339_v55 = vld [vmem:[#allocation4 + $0x348] sm:$0xff]  ;;  %v337_v59 = vld [vmem:[#allocation4 + $0x338] sm:$0xff]  ;;  %v127_v4 = vperm.slane %v124_v2, 1 }
  0x54   :  { %507 = vmatpush.msra.mxu2 %v327_v10  ;;  %530 = vmatpush.msra.mxu3 %v359_v11  ;;  %v235_v56 = vld [vmem:[#allocation4 + $0x8] sm:$0xff]  ;;  %v301_v62 = vld [vmem:[#allocation4 + $0x218] sm:$0xff]  ;;  %v128_v11 = vperm.slane %v124_v2, 2 }
  0x55   :  { %462 = vmatpush.msra.mxu0 %v261_v8  ;;  %485 = vmatpush.msra.mxu1 %v293_v9  ;;  %v267_v57 = vld [vmem:[#allocation4 + $0x108] sm:$0xff]  ;;  %v333_v63 = vld [vmem:[#allocation4 + $0x318] sm:$0xff] }
  0x56   :  { %508 = vmatpush.msra.mxu2 %v325_v18  ;;  %531 = vmatpush.msra.mxu3 %v357_v19  ;;  %v303_v60 = vld [vmem:[#allocation4 + $0x228] sm:$0xff] }
  0x57   :  { %463 = vmatpush.msra.mxu0 %v259_v12  ;;  %486 = vmatpush.msra.mxu1 %v291_v13  ;;  %v335_v61 = vld [vmem:[#allocation4 + $0x328] sm:$0xff]  ;;  %v129_v12 = vperm.slane %v124_v2, 3  ;;  %v571_v13 = vld [vmem:[%s930_s5 + $0x78] sm:$0xff] }
  0x58   :  { %509 = vmatpush.msra.mxu2 %v323_v22  ;;  %532 = vmatpush.msra.mxu3 %v355_v23  ;;  %v299_v0 = vld [vmem:[#allocation4 + $0x208] sm:$0xff] }
  0x59   :  { %464 = vmatpush.msra.mxu0 %v257_v14  ;;  %487 = vmatpush.msra.mxu1 %v289_v15  ;;  %v331_v1 = vld [vmem:[#allocation4 + $0x308] sm:$0xff]  ;;  %v570_v14 = vld [vmem:[%s930_s5 + $0x70] sm:$0xff] }
  0x5a   :  { %510 = vmatpush.msra.mxu2 %v321_v26  ;;  %533 = vmatpush.msra.mxu3 %v353_v27 }
  0x5b   :  { %465 = vmatpush.msra.mxu0 %v255_v16  ;;  %488 = vmatpush.msra.mxu1 %v287_v17  ;;  %v569_v17 = vld [vmem:[%s930_s5 + $0x68] sm:$0xff] }
  0x5c   :  { %511 = vmatpush.msra.mxu2 %v319_v30  ;;  %534 = vmatpush.msra.mxu3 %v351_v31 }
  0x5d   :  { %466 = vmatpush.msra.mxu0 %v253_v20  ;;  %489 = vmatpush.msra.mxu1 %v285_v21 }
  0x5e   :  { %512 = vmatpush.msra.mxu2 %v317_v34  ;;  %535 = vmatpush.msra.mxu3 %v349_v35 }
  0x5f   :  { %467 = vmatpush.msra.mxu0 %v251_v24  ;;  %490 = vmatpush.msra.mxu1 %v283_v25 }
  0x60   :  { %513 = vmatpush.msra.mxu2 %v315_v38  ;;  %536 = vmatpush.msra.mxu3 %v347_v39  ;;  %v564_v38 = vld [vmem:[%s930_s5 + $0x40] sm:$0xff]  ;;  %v563_v39 = vld [vmem:[%s930_s5 + $0x38] sm:$0xff] }
  0x61   :  { %468 = vmatpush.msra.mxu0 %v249_v28  ;;  %491 = vmatpush.msra.mxu1 %v281_v29  ;;  %v568_v28 = vld [vmem:[%s930_s5 + $0x60] sm:$0xff]  ;;  %v567_v29 = vld [vmem:[%s930_s5 + $0x58] sm:$0xff] }
  0x62   :  { %514 = vmatpush.msra.mxu2 %v313_v42  ;;  %537 = vmatpush.msra.mxu3 %v345_v43  ;;  %v586_v42 = vld [vmem:[%s930_s5 + $0xf0] sm:$0xff]  ;;  %v561_v43 = vld [vmem:[%s930_s5 + $0x28] sm:$0xff] }
  0x63   :  { %469 = vmatpush.msra.mxu0 %v247_v32  ;;  %492 = vmatpush.msra.mxu1 %v279_v33  ;;  %v566_v32 = vld [vmem:[%s930_s5 + $0x50] sm:$0xff] }
  0x64   :  { %515 = vmatpush.msra.mxu2 %v311_v46  ;;  %538 = vmatpush.msra.mxu3 %v343_v47  ;;  %v584_v46 = vld [vmem:[%s930_s5 + $0xe0] sm:$0xff]  ;;  %v559_v47 = vld [vmem:[%s930_s5 + $0x18] sm:$0xff] }
  0x65   :  { %470 = vmatpush.msra.mxu0 %v245_v36  ;;  %493 = vmatpush.msra.mxu1 %v277_v37  ;;  %v565_v37 = vld [vmem:[%s930_s5 + $0x48] sm:$0xff] }
  0x66   :  { %516 = vmatpush.msra.mxu2 %v309_v50  ;;  %539 = vmatpush.msra.mxu3 %v341_v51  ;;  %v582_v50 = vld [vmem:[%s930_s5 + $0xd0] sm:$0xff]  ;;  %v557_v51 = vld [vmem:[%s930_s5 + $0x8] sm:$0xff] }
  0x67   :  { %471 = vmatpush.msra.mxu0 %v243_v40  ;;  %494 = vmatpush.msra.mxu1 %v275_v41  ;;  %v587_v40 = vld [vmem:[%s930_s5 + $0xf8] sm:$0xff]  ;;  %v562_v41 = vld [vmem:[%s930_s5 + $0x30] sm:$0xff] }
  0x68   :  { %517 = vmatpush.msra.mxu2 %v307_v54  ;;  %540 = vmatpush.msra.mxu3 %v339_v55  ;;  %v580_v54 = vld [vmem:[%s930_s5 + $0xc0] sm:$0xff]  ;;  %v579_v55 = vld [vmem:[%s930_s5 + $0xb8] sm:$0xff] }
  0x69   :  { %472 = vmatpush.msra.mxu0 %v241_v44  ;;  %495 = vmatpush.msra.mxu1 %v273_v45  ;;  %v585_v44 = vld [vmem:[%s930_s5 + $0xe8] sm:$0xff]  ;;  %v560_v45 = vld [vmem:[%s930_s5 + $0x20] sm:$0xff] }
  0x6a   :  { %518 = vmatpush.msra.mxu2 %v305_v58  ;;  %541 = vmatpush.msra.mxu3 %v337_v59  ;;  %v576_v58 = vld [vmem:[%s930_s5 + $0xa0] sm:$0xff]  ;;  %v575_v59 = vld [vmem:[%s930_s5 + $0x98] sm:$0xff] }
  0x6b   :  { %473 = vmatpush.msra.mxu0 %v239_v48  ;;  %496 = vmatpush.msra.mxu1 %v271_v49  ;;  %v583_v48 = vld [vmem:[%s930_s5 + $0xd8] sm:$0xff]  ;;  %v558_v49 = vld [vmem:[%s930_s5 + $0x10] sm:$0xff] }
  0x6c   :  { %519 = vmatpush.msra.mxu2 %v303_v60  ;;  %542 = vmatpush.msra.mxu3 %v335_v61  ;;  %v574_v60 = vld [vmem:[%s930_s5 + $0x90] sm:$0xff]  ;;  %v362_v61 = vld [vmem:[%s929_s4] sm:$0x3] }
  0x6d   :  { %474 = vmatpush.msra.mxu0 %v237_v52  ;;  %497 = vmatpush.msra.mxu1 %v269_v53  ;;  %v581_v52 = vld [vmem:[%s930_s5 + $0xc8] sm:$0xff]  ;;  %v556_v53 = vld [vmem:[%s930_s5] sm:$0xff] }
  0x6e   :  { %520 = vmatpush.msra.mxu2 %v301_v62  ;;  %543 = vmatpush.msra.mxu3 %v333_v63  ;;  %v573_v63 = vld [vmem:[%s930_s5 + $0x88] sm:$0xff] }
  0x6f   :  { %475 = vmatpush.msra.mxu0 %v235_v56  ;;  %498 = vmatpush.msra.mxu1 %v267_v57  ;;  %v578_v56 = vld [vmem:[%s930_s5 + $0xb0] sm:$0xff]  ;;  %v577_v57 = vld [vmem:[%s930_s5 + $0xa8] sm:$0xff] }
  0x70   :  { %521 = vmatpush.msra.mxu2 %v299_v0  ;;  %544 = vmatpush.msra.mxu3 %v331_v1  ;;  %v364_v0 = vperm.slane %v362_v61, 0  ;;  %v572_v1 = vld [vmem:[%s930_s5 + $0x80] sm:$0xff] }
  0xaa   :  { %v151_v5 = vpop.f32.mrf.mxu0  ;;  %v174_v6 = vpop.f32.mrf.mxu1 }
  0xab   :  { %v152_v7 = vadd.f32 %v151_v5, %v126_v3  ;;  %v175_v8 = vadd.f32 %v174_v6, %v127_v4 }
  0xad   :  { %v226_v9 = vmax.f32 %v152_v7, 0.0  ;;  %v227_v10 = vmax.f32 %v175_v8, 0.0 }
  0xaf   :  { %384 = vmatmul.f32.vlgmr.msrb.gmra.mxu0 %v226_v9  ;;  %407 = vmatmul.f32.vlgmr.msrb.gmra.mxu1 %v227_v10 }
  0xb0   :  { %592 = vmatpush.msrb.mxu0 %v571_v13  ;;  %615 = vmatpush.msrb.mxu1 %v587_v40 }
  0xb1   :  { %v197_v15 = vpop.f32.mrf.mxu2  ;;  %v220_v16 = vpop.f32.mrf.mxu3 }
  0xb2   :  { %v198_v18 = vadd.f32 %v197_v15, %v128_v11  ;;  %v221_v19 = vadd.f32 %v220_v16, %v129_v12  ;;  %v154_v20 = vpop.f32.mrf.mxu0  ;;  %v177_v21 = vpop.f32.mrf.mxu1  ;;  %593 = vmatpush.msrb.mxu0 %v570_v14  ;;  %616 = vmatpush.msrb.mxu1 %v586_v42  ;;  %v365_v15 = vperm.slane %v362_v61, 1 }
  0xb3   :  { %v155_v22 = vadd.f32 %v154_v20, %v126_v3  ;;  %v178_v23 = vadd.f32 %v177_v21, %v127_v4 }
  0xb4   :  { %v228_v24 = vmax.f32 %v198_v18, 0.0  ;;  %v229_v25 = vmax.f32 %v221_v19, 0.0  ;;  %594 = vmatpush.msrb.mxu0 %v569_v17  ;;  %617 = vmatpush.msrb.mxu1 %v585_v44 }
  0xb5   :  { %v230_v26 = vmax.f32 %v155_v22, 0.0  ;;  %v231_v27 = vmax.f32 %v178_v23, 0.0 }
  0xb6   :  { %430 = vmatmul.f32.vlgmr.msrb.gmra.mxu2 %v228_v24  ;;  %453 = vmatmul.f32.vlgmr.msrb.gmra.mxu3 %v229_v25 }
  0xb7   :  { %387 = vmatmul.f32.gmra.mxu0 %v230_v26  ;;  %410 = vmatmul.f32.gmra.mxu1 %v231_v27 }
  0xb8   :  { %595 = vmatpush.msrb.mxu0 %v568_v28  ;;  %657 = vmatpush.msrb.mxu2 %v571_v13 }
  0xb9   :  { %v200_v30 = vpop.f32.mrf.mxu2  ;;  %v223_v31 = vpop.f32.mrf.mxu3  ;;  %673 = vmatpush.msrb.mxu3 %v587_v40  ;;  %618 = vmatpush.msrb.mxu1 %v584_v46 }
  0xba   :  { %v201_v33 = vadd.f32 %v200_v30, %v128_v11  ;;  %v224_v34 = vadd.f32 %v223_v31, %v129_v12  ;;  %596 = vmatpush.msrb.mxu0 %v567_v29  ;;  %658 = vmatpush.msrb.mxu2 %v570_v14 }
  0xbb   :  { %674 = vmatpush.msrb.mxu3 %v586_v42  ;;  %619 = vmatpush.msrb.mxu1 %v583_v48 }
  0xbc   :  { %v232_v35 = vmax.f32 %v201_v33, 0.0  ;;  %v233_v36 = vmax.f32 %v224_v34, 0.0  ;;  %597 = vmatpush.msrb.mxu0 %v566_v32  ;;  %659 = vmatpush.msrb.mxu2 %v569_v17 }
  0xbd   :  { %675 = vmatpush.msrb.mxu3 %v585_v44  ;;  %620 = vmatpush.msrb.mxu1 %v582_v50 }
  0xbe   :  { %433 = vmatmul.f32.gmra.mxu2 %v232_v35  ;;  %456 = vmatmul.f32.gmra.mxu3 %v233_v36 }
  0xbf   :  { %476 = vmatmul.f32.vlgmr.msra.gmra.mxu0 %v226_v9  ;;  %499 = vmatmul.f32.vlgmr.msra.gmra.mxu1 %v227_v10 }
  0xc0   :  { %660 = vmatpush.msrb.mxu2 %v568_v28  ;;  %598 = vmatpush.msrb.mxu0 %v565_v37 }
  0xc1   :  { %676 = vmatpush.msrb.mxu3 %v584_v46  ;;  %621 = vmatpush.msrb.mxu1 %v581_v52 }
  0xc2   :  { %661 = vmatpush.msrb.mxu2 %v567_v29  ;;  %599 = vmatpush.msrb.mxu0 %v564_v38 }
  0xc3   :  { %677 = vmatpush.msrb.mxu3 %v583_v48  ;;  %622 = vmatpush.msrb.mxu1 %v580_v54 }
  0xc4   :  { %662 = vmatpush.msrb.mxu2 %v566_v32  ;;  %600 = vmatpush.msrb.mxu0 %v563_v39 }
  0xc5   :  { %678 = vmatpush.msrb.mxu3 %v582_v50  ;;  %623 = vmatpush.msrb.mxu1 %v579_v55 }
  0xc6   :  { %522 = vmatmul.f32.vlgmr.msra.gmra.mxu2 %v228_v24  ;;  %545 = vmatmul.f32.vlgmr.msra.gmra.mxu3 %v229_v25 }
  0xc7   :  { %479 = vmatmul.f32.gmra.mxu0 %v230_v26  ;;  %502 = vmatmul.f32.gmra.mxu1 %v231_v27 }
  0xc8   :  { %663 = vmatpush.msrb.mxu2 %v565_v37  ;;  %601 = vmatpush.msrb.mxu0 %v562_v41 }
  0xc9   :  { %679 = vmatpush.msrb.mxu3 %v581_v52  ;;  %624 = vmatpush.msrb.mxu1 %v578_v56 }
  0xca   :  { %664 = vmatpush.msrb.mxu2 %v564_v38  ;;  %602 = vmatpush.msrb.mxu0 %v561_v43  ;;  %v695_v38 = vld [vmem:[%s931_s6] ss:$0 sm:$0xff] }
  0xcb   :  { %680 = vmatpush.msrb.mxu3 %v580_v54  ;;  %625 = vmatpush.msrb.mxu1 %v577_v57 }
  0xcc   :  { %665 = vmatpush.msrb.mxu2 %v563_v39  ;;  %603 = vmatpush.msrb.mxu0 %v560_v45 }
  0xcd   :  { %681 = vmatpush.msrb.mxu3 %v579_v55  ;;  %626 = vmatpush.msrb.mxu1 %v576_v58 }
  0xce   :  { %525 = vmatmul.f32.gmra.mxu2 %v232_v35  ;;  %548 = vmatmul.f32.gmra.mxu3 %v233_v36 }
  0xcf   :  { %666 = vmatpush.msrb.mxu2 %v562_v41  ;;  %604 = vmatpush.msrb.mxu0 %v559_v47 }
  0xd0   :  { %682 = vmatpush.msrb.mxu3 %v578_v56  ;;  %627 = vmatpush.msrb.mxu1 %v575_v59 }
  0xd1   :  { %667 = vmatpush.msrb.mxu2 %v561_v43  ;;  %605 = vmatpush.msrb.mxu0 %v558_v49 }
  0xd2   :  { %683 = vmatpush.msrb.mxu3 %v577_v57  ;;  %628 = vmatpush.msrb.mxu1 %v574_v60 }
  0xd3   :  { %668 = vmatpush.msrb.mxu2 %v560_v45  ;;  %606 = vmatpush.msrb.mxu0 %v557_v51 }
  0xd4   :  { %684 = vmatpush.msrb.mxu3 %v576_v58  ;;  %629 = vmatpush.msrb.mxu1 %v573_v63 }
  0xd5   :  { %669 = vmatpush.msrb.mxu2 %v559_v47  ;;  %607 = vmatpush.msrb.mxu0 %v556_v53 }
  0xd6   :  { %685 = vmatpush.msrb.mxu3 %v575_v59  ;;  %630 = vmatpush.msrb.mxu1 %v572_v1 }
  0xd7   :  { %670 = vmatpush.msrb.mxu2 %v558_v49 }
  0xd8   :  { %686 = vmatpush.msrb.mxu3 %v574_v60 }
  0xd9   :  { %671 = vmatpush.msrb.mxu2 %v557_v51 }
  0xda   :  { %687 = vmatpush.msrb.mxu3 %v573_v63 }
  0xdb   :  { %672 = vmatpush.msrb.mxu2 %v556_v53 }
  0xdc   :  { %688 = vmatpush.msrb.mxu3 %v572_v1 }
 0x12c   :  { %v385_v62 = vpop.f32.mrf.mxu0  ;;  %v408_v2 = vpop.f32.mrf.mxu1 }
 0x12d   :  { %v386_v3 = vadd.f32 %v385_v62, %v364_v0 }
 0x12f   :  { %v409_v5 = vadd.f32 %v408_v2, %v386_v3 }
 0x134   :  { %v388_v4 = vpop.f32.mrf.mxu0  ;;  %v411_v10 = vpop.f32.mrf.mxu1 }
 0x135   :  { %v389_v8 = vadd.f32 %v388_v4, %v364_v0 }
 0x137   :  { %v412_v12 = vadd.f32 %v411_v10, %v389_v8 }
 0x139   :  { %v431_v6 = vpop.f32.mrf.mxu2  ;;  %v454_v7 = vpop.f32.mrf.mxu3 }
 0x13a   :  { %v432_v9 = vadd.f32 %v431_v6, %v409_v5 }
 0x13c   :  { %v455_v11 = vadd.f32 %v454_v7, %v432_v9  ;;  %v477_v14 = vpop.f32.mrf.mxu0  ;;  %v500_v21 = vpop.f32.mrf.mxu1 }
 0x13d   :  { %v478_v19 = vadd.f32 %v477_v14, %v365_v15 }
 0x13e   :  { %v552_v13 = vmax.f32 %v455_v11, 0.0 }
 0x13f   :  { %v501_v23 = vadd.f32 %v500_v21, %v478_v19 }
 0x140   :  { %608 = vmatmul.f32.vlgmr.msrb.gmra.mxu0 %v552_v13 }
 0x141   :  { %v434_v16 = vpop.f32.mrf.mxu2  ;;  %v457_v17 = vpop.f32.mrf.mxu3 }
 0x142   :  { %v435_v18 = vadd.f32 %v434_v16, %v412_v12 }
 0x144   :  { %v458_v20 = vadd.f32 %v457_v17, %v435_v18  ;;  %v480_v24 = vpop.f32.mrf.mxu0  ;;  %v503_v31 = vpop.f32.mrf.mxu1 }
 0x145   :  { %v481_v28 = vadd.f32 %v480_v24, %v365_v15 }
 0x146   :  { %v554_v22 = vmax.f32 %v458_v20, 0.0 }
 0x147   :  { %v504_v32 = vadd.f32 %v503_v31, %v481_v28 }
 0x148   :  { %611 = vmatmul.f32.vlgmr.msrb.gmra.mxu2 %v554_v22 }
 0x149   :  { %v523_v25 = vpop.f32.mrf.mxu2  ;;  %v546_v26 = vpop.f32.mrf.mxu3 }
 0x14a   :  { %v524_v27 = vadd.f32 %v523_v25, %v501_v23 }
 0x14c   :  { %v547_v29 = vadd.f32 %v546_v26, %v524_v27 }
 0x14e   :  { %v553_v30 = vmax.f32 %v547_v29, 0.0 }
 0x150   :  { %631 = vmatmul.f32.vlgmr.msrb.gmra.mxu1 %v553_v30 }
 0x151   :  { %v526_v33 = vpop.f32.mrf.mxu2  ;;  %v549_v35 = vpop.f32.mrf.mxu3 }
 0x152   :  { %v527_v34 = vadd.f32 %v526_v33, %v504_v32 }
 0x154   :  { %v550_v36 = vadd.f32 %v549_v35, %v527_v34 }
 0x156   :  { %v555_v37 = vmax.f32 %v550_v36, 0.0 }
 0x158   :  { %634 = vmatmul.f32.vlgmr.msrb.gmra.mxu3 %v555_v37 }
 0x1bd   :  { %v609_v39 = vpop.f32.mrf.mxu0 }
 0x1be   :  { %v610_v40 = vadd.f32 %v695_v38, %v609_v39 }
 0x1cb   :  { %v612_v45 = vpop.f32.mrf.mxu2 }
 0x1cc   :  { %v613_v47 = vadd.f32 %v695_v38, %v612_v45 }
 0x1cd   :  { %v632_v41 = vpop.f32.mrf.mxu1 }
 0x1ce   :  { %v633_v42 = vadd.f32 %v632_v41, %v610_v40 }
 0x1d0   :  { %v638_v43 = vsub.f32 0.0, %v633_v42 }
 0x1d2   :  { %v640_v44 = vmul.f32 1.442695, %v638_v43 }
 0x1d4   :  { %696 = vpow2.f32 %v640_v44 }
 0x1da   :  { %v697_v46 = vpop.eup %696 }
 0x1db   :  { %v644_v48 = vadd.f32 1.0, %v697_v46  ;;  %v635_v49 = vpop.f32.mrf.mxu3 }
 0x1dc   :  { %v636_v50 = vadd.f32 %v635_v49, %v613_v47 }
 0x1dd   :  { %698 = vrcp.f32 %v644_v48 }
 0x1de   :  { %v639_v51 = vsub.f32 0.0, %v636_v50 }
 0x1e0   :  { %v642_v52 = vmul.f32 1.442695, %v639_v51 }
 0x1e2   :  { %700 = vpow2.f32 %v642_v52 }
 0x1e3   :  { %v699_v53 = vpop.eup %698 }
 0x1e4   :  { %649 = vst.msk [vmem:[%s932_s7] sm:$0xff] %vm648_vm0, %v699_v53 }
 0x1e8   :  { %v701_v54 = vpop.eup %700 }
 0x1e9   :  { %v645_v55 = vadd.f32 1.0, %v701_v54 }
 0x1eb   :  { %702 = vrcp.f32 %v645_v55 }
 0x1f1   :  { %v703_v56 = vpop.eup %702 }
 0x1f2   :  { %650 = vst.msk [vmem:[%s932_s7 + $0x8] sm:$0xff] %vm648_vm0, %v703_v56 }
 0x1f3   :  { %655 = vsyncpa [#allocation3], 1 }
 0x1f4   :  { %656 = vsyncpa [#allocation5], 1 }

</bundles_post_ra>
